<compile_context>
chip_gen: v5e
topology: v5e:2x2
jax: 0.10.0
libtpu: 0.0.40
codegen_flags: <defaults>
</compile_context>

<pallas_src>
import functools

import jax
import jax.numpy as jnp
from jax.experimental import pallas as pl
from jax.experimental.pallas import tpu as pltpu

ROW_TILE = 8    # sublane-aligned row tile (real batch rows packed here)
PAD = 128       # lane-aligned padded feature width
N_LAYERS = 4


# --------------------------------------------------------------------------
# Kernel
# --------------------------------------------------------------------------
def _ampc_kernel(x_ref, w_ref, b_ref, o_ref):
    """One (ROW_TILE, PAD) row tile through the 4-layer MLP.

    x_ref: (ROW_TILE, PAD) f32      activations (zero-padded cols)
    w_ref: (4, PAD, PAD)   bf16     stacked, zero-padded weights
    b_ref: (4, ROW_TILE, PAD) f32   stacked, zero-padded, row-broadcast biases
    o_ref: (ROW_TILE, PAD) f32      output tile (cols >= output_size are zero)
    """
    x = x_ref[...]  # f32

    # hidden1..hidden3: bf16 MXU matmul, f32 accumulate, f32 bias + tanh.
    h = jnp.tanh(
        jnp.dot(x.astype(jnp.bfloat16), w_ref[0],
                preferred_element_type=jnp.float32) + b_ref[0])
    h = jnp.tanh(
        jnp.dot(h.astype(jnp.bfloat16), w_ref[1],
                preferred_element_type=jnp.float32) + b_ref[1])
    h = jnp.tanh(
        jnp.dot(h.astype(jnp.bfloat16), w_ref[2],
                preferred_element_type=jnp.float32) + b_ref[2])
    # output layer: no activation.
    o_ref[...] = (
        jnp.dot(h.astype(jnp.bfloat16), w_ref[3],
                preferred_element_type=jnp.float32) + b_ref[3])


def _forward_padded(xp, w_stack, b_stack):
    """xp: (n_rows, PAD) f32 with n_rows % ROW_TILE == 0. Returns (n_rows, PAD) f32."""
    n_rows = xp.shape[0]
    n_tiles = n_rows // ROW_TILE
    return pl.pallas_call(
        _ampc_kernel,
        out_shape=jax.ShapeDtypeStruct((n_rows, PAD), jnp.float32),
        grid_spec=pltpu.PrefetchScalarGridSpec(
            num_scalar_prefetch=0,
            grid=(n_tiles,),
            in_specs=[
                pl.BlockSpec((ROW_TILE, PAD), lambda i: (i, 0)),
                # Constant index maps: weights/biases stay resident in VMEM.
                pl.BlockSpec((N_LAYERS, PAD, PAD), lambda i: (0, 0, 0)),
                pl.BlockSpec((N_LAYERS, ROW_TILE, PAD), lambda i: (0, 0, 0)),
            ],
            out_specs=pl.BlockSpec((ROW_TILE, PAD), lambda i: (i, 0)),
        ),
        compiler_params=pltpu.CompilerParams(
            dimension_semantics=("parallel",)),   # shard batch tiles across TCs (v7x)
    )(xp, w_stack, b_stack)


# --------------------------------------------------------------------------
# Host-side parameter preparation (done ONCE, not per inference call)
# --------------------------------------------------------------------------
def _pad2d(a, rows, cols):
    out = jnp.zeros((rows, cols), jnp.float32)
    return out.at[: a.shape[0], : a.shape[1]].set(a.astype(jnp.float32))


def prepare_params(params):
    """Pack raw (w1,b1,...,w4,b4) into padded, stacked device arrays.

    Returns:
      w_stack: (4, PAD, PAD) bf16   zero-padded weight matrices
      b_stack: (4, ROW_TILE, PAD) f32  zero-padded biases, broadcast to 8 rows
    """
    w1, b1, w2, b2, w3, b3, w4, b4 = params
    ws = (w1, w2, w3, w4)
    bs = (b1, b2, b3, b4)
    w_stack = jnp.stack([_pad2d(w, PAD, PAD) for w in ws]).astype(jnp.bfloat16)
    b_stack = jnp.stack([
        jnp.broadcast_to(_pad2d(b[None, :], 1, PAD), (ROW_TILE, PAD)) for b in bs
    ]).astype(jnp.float32)
    return jax.device_put(w_stack), jax.device_put(b_stack)


# --------------------------------------------------------------------------
# Public wrappers (match the PyTorch forward semantics)
# --------------------------------------------------------------------------
@functools.partial(jax.jit, static_argnames=("horizon",))
def ampcnet_inference(x, w_stack, b_stack, horizon):
    """Single-sample forward. x: (input_size,) or (1, input_size).
    Returns (1, horizon, 1) float32, matching x.view(1, horizon, 1)."""
    x2d = jnp.reshape(x, (1, -1)).astype(jnp.float32)
    xp = jnp.zeros((ROW_TILE, PAD), jnp.float32)
    xp = xp.at[:1, : x2d.shape[1]].set(x2d)
    out = _forward_padded(xp, w_stack, b_stack)
    return out[0, :horizon].reshape(1, horizon, 1)


@functools.partial(jax.jit, static_argnames=("out_size",))
def ampcnet_forward_batched(xb, w_stack, b_stack, out_size):
    """Batched forward (e.g. MPC candidate rollouts). xb: (N, input_size).
    Returns (N, out_size) float32."""
    n, d = xb.shape
    n_pad = ((n + ROW_TILE - 1) // ROW_TILE) * ROW_TILE
    xp = jnp.zeros((n_pad, PAD), jnp.float32)
    xp = xp.at[:n, :d].set(xb.astype(jnp.float32))
    out = _forward_padded(xp, w_stack, b_stack)
    return out[:n, :out_size]


# --------------------------------------------------------------------------
# Reference implementations + init (for the self-check)
# --------------------------------------------------------------------------
def init_params(key, input_size, output_size):
    """PyTorch nn.Linear-style init: U(-1/sqrt(fan_in), 1/sqrt(fan_in))."""
    dims = [(input_size, 2), (2, 50), (50, 50), (50, output_size)]
    params = []
    for fan_in, fan_out in dims:
        key, kw, kb = jax.random.split(key, 3)
        bound = 1.0 / jnp.sqrt(float(fan_in))
        w = jax.random.uniform(kw, (fan_in, fan_out), jnp.float32, -bound, bound)
        b = jax.random.uniform(kb, (fan_out,), jnp.float32, -bound, bound)
        params.extend([w, b])
    return tuple(params)


def ampcnet_reference_f32(x, params):
    """Plain f32 JAX reference of the PyTorch forward (per-row)."""
    w1, b1, w2, b2, w3, b3, w4, b4 = params
    h = jnp.reshape(x, (-1, w1.shape[0])).astype(jnp.float32)
    h = jnp.tanh(h @ w1 + b1)
    h = jnp.tanh(h @ w2 + b2)
    h = jnp.tanh(h @ w3 + b3)
    return h @ w4 + b4


def ampcnet_reference_bf16(x, params):
    """Reference with bf16 matmul operands / f32 accumulation (kernel's numerics)."""
    w1, b1, w2, b2, w3, b3, w4, b4 = params

    def dot(a, w):
        return jax.lax.dot(a.astype(jnp.bfloat16), w.astype(jnp.bfloat16),
                           preferred_element_type=jnp.float32)

    h = jnp.reshape(x, (-1, w1.shape[0])).astype(jnp.float32)
    h = jnp.tanh(dot(h, w1) + b1)
    h = jnp.tanh(dot(h, w2) + b2)
    h = jnp.tanh(dot(h, w3) + b3)
    return dot(h, w4) + b4


# --------------------------------------------------------------------------
# Self-test
# --------------------------------------------------------------------------
if __name__ == "__main__":
    input_size = 8
    horizon = 8
    output_size = horizon  # forward's view(1, horizon, 1) implies this

    key = jax.random.PRNGKey(0)
    key, kx, kxb = jax.random.split(key, 3)
    params = init_params(key, input_size, output_size)
    w_stack, b_stack = prepare_params(params)   # one-time padding/packing

    # --- single-sample forward (matches the PyTorch module exactly) ---
    x = jax.random.normal(kx, (1, input_size), jnp.float32)
    out = jax.block_until_ready(ampcnet_inference(x, w_stack, b_stack, horizon))
    assert out.shape == (1, horizon, 1)

    ref_bf16 = ampcnet_reference_bf16(x, params).reshape(1, horizon, 1)
    ref_f32 = ampcnet_reference_f32(x, params).reshape(1, horizon, 1)
    # Tight check vs. a reference using the same bf16-operand numerics.
    assert jnp.allclose(out, ref_bf16, atol=1e-3, rtol=1e-3)
    # Loose check vs. the pure-f32 PyTorch-equivalent reference (bf16 matmuls).
    assert jnp.allclose(out, ref_f32, atol=5e-2, rtol=5e-2)

    # --- batched forward (2 grid tiles; "parallel" axis for v7x megacore) ---
    xb = jax.random.normal(kxb, (16, input_size), jnp.float32)
    outb = jax.block_until_ready(
        ampcnet_forward_batched(xb, w_stack, b_stack, output_size))
    assert outb.shape == (16, output_size)
    refb = ampcnet_reference_bf16(xb, params)
    assert jnp.allclose(outb, refb, atol=1e-3, rtol=1e-3)

    print("KERNEL_OK")
</pallas_src>

<mosaic_0001>
module attributes {stable_mosaic.version = 11 : i64} {
  func.func @_ampc_kernel(%arg0: i32, %arg1: memref<8x128xf32, #tpu.memory_space<vmem>>, %arg2: memref<4x128x128xbf16, #tpu.memory_space<vmem>>, %arg3: memref<4x8x128xf32, #tpu.memory_space<vmem>>, %arg4: memref<8x128xf32, #tpu.memory_space<vmem>>) attributes {dimension_semantics = [#tpu.dimension_semantics<parallel>], iteration_bounds = array<i64: 1>, scalar_prefetch = 0 : i64, scratch_operands = 0 : i64, tpu.core_type = #tpu.core_type<tc>, window_params = [{transform_indices = @transform_0, window_bounds = array<i64: 8, 128>}, {pipeline_mode = #tpu.pipeline_mode<synchronous>, transform_indices = @transform_1, window_bounds = array<i64: 4, 128, 128>}, {pipeline_mode = #tpu.pipeline_mode<synchronous>, transform_indices = @transform_2, window_bounds = array<i64: 4, 8, 128>}, {transform_indices = @transform_3, window_bounds = array<i64: 8, 128>}]} {
    %c0 = arith.constant 0 : index
    %c0_0 = arith.constant 0 : index
    %0 = vector.load %arg1[%c0, %c0_0] : memref<8x128xf32, #tpu.memory_space<vmem>>, vector<8x128xf32>
    %1 = arith.truncf %0 : vector<8x128xf32> to vector<8x128xbf16>
    %c0_1 = arith.constant 0 : index
    %c0_2 = arith.constant 0 : index
    %c0_3 = arith.constant 0 : index
    %2 = vector.load %arg2[%c0_1, %c0_2, %c0_3] : memref<4x128x128xbf16, #tpu.memory_space<vmem>>, vector<1x128x128xbf16>
    %3 = vector.shape_cast %2 : vector<1x128x128xbf16> to vector<128x128xbf16>
    %cst = arith.constant dense<0.000000e+00> : vector<8x128xf32>
    %4 = tpu.matmul %1, %3, %cst {dimension_numbers = #tpu.dot_dimension_numbers<[1], [0], [0], [1], [0, 0, 1, 1], [], []>} : vector<8x128xbf16>, vector<128x128xbf16>, vector<8x128xf32> -> vector<8x128xf32>
    %c0_4 = arith.constant 0 : index
    %c0_5 = arith.constant 0 : index
    %c0_6 = arith.constant 0 : index
    %5 = vector.load %arg3[%c0_4, %c0_5, %c0_6] : memref<4x8x128xf32, #tpu.memory_space<vmem>>, vector<1x8x128xf32>
    %6 = vector.shape_cast %5 : vector<1x8x128xf32> to vector<8x128xf32>
    %7 = arith.addf %4, %6 : vector<8x128xf32>
    %8 = math.tanh %7 : vector<8x128xf32>
    %9 = arith.truncf %8 : vector<8x128xf32> to vector<8x128xbf16>
    %c1 = arith.constant 1 : index
    %c0_7 = arith.constant 0 : index
    %c0_8 = arith.constant 0 : index
    %10 = vector.load %arg2[%c1, %c0_7, %c0_8] : memref<4x128x128xbf16, #tpu.memory_space<vmem>>, vector<1x128x128xbf16>
    %11 = vector.shape_cast %10 : vector<1x128x128xbf16> to vector<128x128xbf16>
    %cst_9 = arith.constant dense<0.000000e+00> : vector<8x128xf32>
    %12 = tpu.matmul %9, %11, %cst_9 {dimension_numbers = #tpu.dot_dimension_numbers<[1], [0], [0], [1], [0, 0, 1, 1], [], []>} : vector<8x128xbf16>, vector<128x128xbf16>, vector<8x128xf32> -> vector<8x128xf32>
    %c1_10 = arith.constant 1 : index
    %c0_11 = arith.constant 0 : index
    %c0_12 = arith.constant 0 : index
    %13 = vector.load %arg3[%c1_10, %c0_11, %c0_12] : memref<4x8x128xf32, #tpu.memory_space<vmem>>, vector<1x8x128xf32>
    %14 = vector.shape_cast %13 : vector<1x8x128xf32> to vector<8x128xf32>
    %15 = arith.addf %12, %14 : vector<8x128xf32>
    %16 = math.tanh %15 : vector<8x128xf32>
    %17 = arith.truncf %16 : vector<8x128xf32> to vector<8x128xbf16>
    %c2 = arith.constant 2 : index
    %c0_13 = arith.constant 0 : index
    %c0_14 = arith.constant 0 : index
    %18 = vector.load %arg2[%c2, %c0_13, %c0_14] : memref<4x128x128xbf16, #tpu.memory_space<vmem>>, vector<1x128x128xbf16>
    %19 = vector.shape_cast %18 : vector<1x128x128xbf16> to vector<128x128xbf16>
    %cst_15 = arith.constant dense<0.000000e+00> : vector<8x128xf32>
    %20 = tpu.matmul %17, %19, %cst_15 {dimension_numbers = #tpu.dot_dimension_numbers<[1], [0], [0], [1], [0, 0, 1, 1], [], []>} : vector<8x128xbf16>, vector<128x128xbf16>, vector<8x128xf32> -> vector<8x128xf32>
    %c2_16 = arith.constant 2 : index
    %c0_17 = arith.constant 0 : index
    %c0_18 = arith.constant 0 : index
    %21 = vector.load %arg3[%c2_16, %c0_17, %c0_18] : memref<4x8x128xf32, #tpu.memory_space<vmem>>, vector<1x8x128xf32>
    %22 = vector.shape_cast %21 : vector<1x8x128xf32> to vector<8x128xf32>
    %23 = arith.addf %20, %22 : vector<8x128xf32>
    %24 = math.tanh %23 : vector<8x128xf32>
    %25 = arith.truncf %24 : vector<8x128xf32> to vector<8x128xbf16>
    %c3 = arith.constant 3 : index
    %c0_19 = arith.constant 0 : index
    %c0_20 = arith.constant 0 : index
    %26 = vector.load %arg2[%c3, %c0_19, %c0_20] : memref<4x128x128xbf16, #tpu.memory_space<vmem>>, vector<1x128x128xbf16>
    %27 = vector.shape_cast %26 : vector<1x128x128xbf16> to vector<128x128xbf16>
    %cst_21 = arith.constant dense<0.000000e+00> : vector<8x128xf32>
    %28 = tpu.matmul %25, %27, %cst_21 {dimension_numbers = #tpu.dot_dimension_numbers<[1], [0], [0], [1], [0, 0, 1, 1], [], []>} : vector<8x128xbf16>, vector<128x128xbf16>, vector<8x128xf32> -> vector<8x128xf32>
    %c3_22 = arith.constant 3 : index
    %c0_23 = arith.constant 0 : index
    %c0_24 = arith.constant 0 : index
    %29 = vector.load %arg3[%c3_22, %c0_23, %c0_24] : memref<4x8x128xf32, #tpu.memory_space<vmem>>, vector<1x8x128xf32>
    %30 = vector.shape_cast %29 : vector<1x8x128xf32> to vector<8x128xf32>
    %31 = arith.addf %28, %30 : vector<8x128xf32>
    %c0_25 = arith.constant 0 : index
    %c0_26 = arith.constant 0 : index
    %32 = vector.load %arg4[%c0_25, %c0_26] : memref<8x128xf32, #tpu.memory_space<vmem>>, vector<8x128xf32>
    tpu.vector_store %arg4[%c0_25, %c0_26], %31 {strides = array<i32>} : memref<8x128xf32, #tpu.memory_space<vmem>>, vector<8x128xf32>,
    return
  }
  func.func @transform_0(%arg0: i32) -> (i32, i32) {
    %c0_i32 = arith.constant 0 : i32
    %c0_i32_0 = arith.constant 0 : i32
    return %arg0, %c0_i32 : i32, i32
  }
  func.func @transform_1(%arg0: i32) -> (i32, i32, i32) {
    %c0_i32 = arith.constant 0 : i32
    %c0_i32_0 = arith.constant 0 : i32
    %c0_i32_1 = arith.constant 0 : i32
    %c0_i32_2 = arith.constant 0 : i32
    return %c0_i32, %c0_i32_0, %c0_i32_1 : i32, i32, i32
  }
  func.func @transform_2(%arg0: i32) -> (i32, i32, i32) {
    %c0_i32 = arith.constant 0 : i32
    %c0_i32_0 = arith.constant 0 : i32
    %c0_i32_1 = arith.constant 0 : i32
    %c0_i32_2 = arith.constant 0 : i32
    return %c0_i32, %c0_i32_0, %c0_i32_1 : i32, i32, i32
  }
  func.func @transform_3(%arg0: i32) -> (i32, i32) {
    %c0_i32 = arith.constant 0 : i32
    %c0_i32_0 = arith.constant 0 : i32
    return %arg0, %c0_i32 : i32, i32
  }
}

</mosaic_0001>

<bundles_post_ra>
// kernel: ampcnet_inference.1
= control target key start
LH: loop header
LB: loop body
LE: loop exit
PB: predicated region body
PF: predicated region fallthrough
CT: control target
= control target key end

     0   :  { %8 = vsyncpa [#allocation3], 0  ;;  %s641_s0 = inlined_call_operand.vmem [shape: f32[8,128], index: 0, kind: input, shape index: {}]   ;;  %s642_s1 = inlined_call_operand.hbm [shape: bf16[4,128,128], index: 1, kind: input, shape index: {}]   ;;  %s643_s2 = inlined_call_operand.hbm [shape: f32[4,8,128], index: 2, kind: input, shape index: {}]   ;;  %s644_s3 = inlined_call_operand.vmem [shape: f32[8,128], index: 3, kind: output, shape index: {}]  }
   0x1   :  { %s16_s14 = sshll.u32 %s642_s1, 4  ;;  %s17_s14 = int_to_ptr.hbm [resolvable:$true] %s16_s14 }
   0x2   :  { %9 = vsyncpa [#allocation5], 0  ;;  %s603_s15 = smov [#allocation2]   ;;  %s29_s19 = sshll.u32 %s643_s2, 4  ;;  %s30_s19 = int_to_ptr.hbm [resolvable:$true] %s29_s19 }
   0x3   :  { %s18_s16 = sshll.u32 %s603_s15, 4  ;;  %s604_s20 = smov 64   ;;  %s19_s16 = int_to_ptr.vmem [resolvable:$true] %s18_s16 }
   0x4   :  { %s605_s21 = smov 4   ;;  %s606_s22 = smov [#allocation4]  }
   0x5   :  { %24 = dma.hbm_to_vmem [thread:$0]  %s17_s14, 4096, %s19_s16, [#allocation3], %s604_s20, %s604_s20, %s605_s21  }
   0x6   :  { %s31_s23 = sshll.u32 %s606_s22, 4  ;;  %s607_s24 = smov 128   ;;  %s32_s23 = int_to_ptr.vmem [resolvable:$true] %s31_s23 }
   0x7   :  { %s608_s25 = smov 8  }
   0x8   :  { %37 = dma.hbm_to_vmem [thread:$0]  %s30_s19, 512, %s32_s23, [#allocation5], %s607_s24, %s607_s24, %s608_s25  }
   0x9   :  { %599 = dma.done.wait [#allocation3], 4096  }
   0xa   :  { %600 = vsyncadd [#allocation3], 4294963200 }
   0xb   :  { %601 = dma.done.wait [#allocation5], 512  }
   0xc   :  { %602 = vsyncadd [#allocation5], 4294966784  ;;  %v514_v0 = vld [vmem:[#allocation2 + $0x38] sm:$0xff]  ;;  %v513_v1 = vld [vmem:[#allocation2 + $0x30] sm:$0xff] }
   0xd   :  { %113 = vmatpush.bf16.msra.mxu0 %v514_v0  ;;  %v522_v2 = vld [vmem:[#allocation2 + $0x78] sm:$0xff]  ;;  %v521_v3 = vld [vmem:[#allocation2 + $0x70] sm:$0xff]  ;;  %v512_v4 = vld [vmem:[#allocation2 + $0x28] sm:$0xff] }
   0xe   :  { %195 = vmatpush.bf16.msra.mxu1 %v522_v2  ;;  %v520_v5 = vld [vmem:[#allocation2 + $0x68] sm:$0xff]  ;;  %v511_v6 = vld [vmem:[#allocation2 + $0x20] sm:$0xff]  ;;  %v510_v8 = vld [vmem:[#allocation2 + $0x18] sm:$0xff] }
   0xf   :  { %v519_v7 = vld [vmem:[#allocation2 + $0x60] sm:$0xff]  ;;  %v518_v9 = vld [vmem:[#allocation2 + $0x58] sm:$0xff]  ;;  %v509_v10 = vld [vmem:[#allocation2 + $0x10] sm:$0xff] }
  0x10   :  { %v508_v11 = vld [vmem:[#allocation2 + $0x8] sm:$0xff]  ;;  %v507_v12 = vld [vmem:[#allocation2] sm:$0xff]  ;;  %v517_v15 = vld [vmem:[#allocation2 + $0x50] sm:$0xff] }
  0x11   :  { %114 = vmatpush.bf16.msra.mxu0 %v513_v1  ;;  %v46_v13 = vld [vmem:[%s641_s0] sm:$0xff]  ;;  %v516_v16 = vld [vmem:[#allocation2 + $0x48] sm:$0xff]  ;;  %v530_v18 = vld [vmem:[#allocation2 + $0xb8] sm:$0xff] }
  0x12   :  { %196 = vmatpush.bf16.msra.mxu1 %v521_v3  ;;  %v47_v14 = vpack.c.bf16 %v46_v13, %v46_v13  ;;  %v515_v17 = vld [vmem:[#allocation2 + $0x40] sm:$0xff]  ;;  %277 = vmatpush.bf16.msra.mxu2 %v530_v18  ;;  %v529_v19 = vld [vmem:[#allocation2 + $0xb0] sm:$0xff]  ;;  %v528_v20 = vld [vmem:[#allocation2 + $0xa8] sm:$0xff] }
  0x13   :  { %v527_v21 = vld [vmem:[#allocation2 + $0xa0] sm:$0xff]  ;;  %v526_v22 = vld [vmem:[#allocation2 + $0x98] sm:$0xff]  ;;  %v525_v29 = vld [vmem:[#allocation2 + $0x90] sm:$0xff] }
  0x14   :  { %v64_v23 = vld [vmem:[#allocation4] sm:$0xff]  ;;  %v524_v30 = vld [vmem:[#allocation2 + $0x88] sm:$0xff]  ;;  %v538_v32 = vld [vmem:[#allocation2 + $0xf8] sm:$0xff] }
  0x15   :  { %115 = vmatpush.bf16.msra.mxu0 %v512_v4  ;;  %v523_v31 = vld [vmem:[#allocation2 + $0x80] sm:$0xff]  ;;  %359 = vmatpush.bf16.msra.mxu3 %v538_v32  ;;  %v537_v33 = vld [vmem:[#allocation2 + $0xf0] sm:$0xff]  ;;  %v536_v34 = vld [vmem:[#allocation2 + $0xe8] sm:$0xff] }
  0x16   :  { %197 = vmatpush.bf16.msra.mxu1 %v520_v5  ;;  %278 = vmatpush.bf16.msra.mxu2 %v529_v19  ;;  %v535_v35 = vld [vmem:[#allocation2 + $0xe0] sm:$0xff]  ;;  %v534_v36 = vld [vmem:[#allocation2 + $0xd8] sm:$0xff]  ;;  %v146_v37 = vld [vmem:[#allocation4 + $0x8] sm:$0xff] }
  0x17   :  { %v533_v43 = vld [vmem:[#allocation2 + $0xd0] sm:$0xff]  ;;  %v532_v44 = vld [vmem:[#allocation2 + $0xc8] sm:$0xff]  ;;  %v531_v45 = vld [vmem:[#allocation2 + $0xc0] sm:$0xff] }
  0x18   :  { %v228_v46 = vld [vmem:[#allocation4 + $0x10] sm:$0xff]  ;;  %v310_v52 = vld [vmem:[#allocation4 + $0x18] sm:$0xff] }
  0x19   :  { %116 = vmatpush.bf16.msra.mxu0 %v511_v6  ;;  %360 = vmatpush.bf16.msra.mxu3 %v537_v33 }
  0x1a   :  { %198 = vmatpush.bf16.msra.mxu1 %v519_v7  ;;  %279 = vmatpush.bf16.msra.mxu2 %v528_v20 }
  0x1d   :  { %117 = vmatpush.bf16.msra.mxu0 %v510_v8  ;;  %361 = vmatpush.bf16.msra.mxu3 %v536_v34 }
  0x1e   :  { %199 = vmatpush.bf16.msra.mxu1 %v518_v9  ;;  %280 = vmatpush.bf16.msra.mxu2 %v527_v21 }
  0x21   :  { %118 = vmatpush.bf16.msra.mxu0 %v509_v10  ;;  %362 = vmatpush.bf16.msra.mxu3 %v535_v35 }
  0x22   :  { %200 = vmatpush.bf16.msra.mxu1 %v517_v15  ;;  %281 = vmatpush.bf16.msra.mxu2 %v526_v22 }
  0x25   :  { %119 = vmatpush.bf16.msra.mxu0 %v508_v11  ;;  %363 = vmatpush.bf16.msra.mxu3 %v534_v36 }
  0x26   :  { %201 = vmatpush.bf16.msra.mxu1 %v516_v16  ;;  %282 = vmatpush.bf16.msra.mxu2 %v525_v29 }
  0x29   :  { %120 = vmatpush.bf16.msra.mxu0 %v507_v12  ;;  %364 = vmatpush.bf16.msra.mxu3 %v533_v43 }
  0x2a   :  { %202 = vmatpush.bf16.msra.mxu1 %v515_v17  ;;  %283 = vmatpush.bf16.msra.mxu2 %v524_v30 }
  0x2c   :  { %121 = vmatmul.bf16.vlgmr.msra.gmra.mxu0 %v47_v14 }
  0x2d   :  { %365 = vmatpush.bf16.msra.mxu3 %v532_v44 }
  0x2e   :  { %284 = vmatpush.bf16.msra.mxu2 %v523_v31 }
  0x31   :  { %366 = vmatpush.bf16.msra.mxu3 %v531_v45 }
  0xa9   :  { %v122_v24 = vpop.f32.mrf.mxu0 }
  0xaa   :  { %v123_v25 = vadd.f32 %v122_v24, %v64_v23 }
  0xac   :  { %545 = vtanh.f32 %v123_v25 }
  0xb1   :  { %v124_v26 = vpop.f32.mrf.mxu0 }
  0xb2   :  { %v546_v27 = vpop.eup %545 }
  0xb3   :  { %v127_v28 = vpack.c.bf16 %v546_v27, %v546_v27 }
  0xb5   :  { %203 = vmatmul.bf16.vlgmr.msra.gmra.mxu1 %v127_v28 }
 0x132   :  { %v204_v38 = vpop.f32.mrf.mxu1 }
 0x133   :  { %v205_v39 = vadd.f32 %v204_v38, %v146_v37 }
 0x135   :  { %547 = vtanh.f32 %v205_v39 }
 0x13a   :  { %v206_v40 = vpop.f32.mrf.mxu1 }
 0x13b   :  { %v548_v41 = vpop.eup %547 }
 0x13c   :  { %v209_v42 = vpack.c.bf16 %v548_v41, %v548_v41 }
 0x13e   :  { %285 = vmatmul.bf16.vlgmr.msra.gmra.mxu2 %v209_v42 }
 0x1c1   :  { %v286_v47 = vpop.f32.mrf.mxu2 }
 0x1c2   :  { %v287_v48 = vadd.f32 %v286_v47, %v228_v46 }
 0x1c4   :  { %549 = vtanh.f32 %v287_v48 }
 0x1c9   :  { %v288_v49 = vpop.f32.mrf.mxu2 }
 0x1ca   :  { %v550_v50 = vpop.eup %549 }
 0x1cb   :  { %v291_v51 = vpack.c.bf16 %v550_v50, %v550_v50 }
 0x1cd   :  { %367 = vmatmul.bf16.vlgmr.msra.gmra.mxu3 %v291_v51 }
 0x250   :  { %v368_v53 = vpop.f32.mrf.mxu3 }
 0x251   :  { %v369_v54 = vadd.f32 %v368_v53, %v310_v52 }
 0x253   :  { %372 = vst [vmem:[%s644_s3] sm:$0xff] %v369_v54 }
 0x258   :  { %v370_v55 = vpop.f32.mrf.mxu3 }
 0x259   :  { %377 = vsyncpa [#allocation3], 1 }
 0x25a   :  { %378 = vsyncpa [#allocation5], 1 }

</bundles_post_ra>
